<compile_context>
chip_gen: v5e
topology: v5e:2x2
jax: 0.10.0
libtpu: 0.0.40
codegen_flags: <defaults>
</compile_context>

<pallas_src>
import functools

import jax
import jax.numpy as jnp
from jax.experimental import pallas as pl
from jax.experimental.pallas import tpu as pltpu

_MiB = 1024 * 1024


def _round_up(x, m):
    return (x + m - 1) // m * m


def _vmem_limit_bytes():
    cap = None
    try:
        cap = getattr(pltpu.get_tpu_info(), "vmem_capacity_bytes", None)
    except Exception:
        cap = None
    if not cap:
        cap = 64 * _MiB
    # Treat the reported capacity as an upper bound but always stay below the
    # smallest per-TensorCore VMEM across generations (v7x: 64 MiB/TC), with headroom.
    return int(min(max(32 * _MiB, int(0.7 * cap)), 48 * _MiB))


def _adain_kernel(x_ref, wb_ref, o_ref, *, eps, inv_hw):
    # x_ref: (tile_bc, HW)   wb_ref: (tile_bc, 2) = [weight | bias]
    x = x_ref[...].astype(jnp.float32)
    mu = jnp.sum(x, axis=-1, keepdims=True) * inv_hw
    xc = x - mu
    var = jnp.sum(xc * xc, axis=-1, keepdims=True) * inv_hw   # biased variance
    inv_std = jax.lax.rsqrt(var + eps)
    wb = wb_ref[...].astype(jnp.float32)
    scale = inv_std * wb[:, 0:1]
    o_ref[...] = (xc * scale + wb[:, 1:2]).astype(o_ref.dtype)


def adaptive_instance_norm_2d(x, weight, bias, *, eps=1e-5, tile_bc=None):
    """x: (B, C, H, W); weight/bias: (B*C,). Returns (B, C, H, W)."""
    B, C, H, W = x.shape
    BC, HW = B * C, H * W
    assert weight.shape == (BC,) and bias.shape == (BC,)

    vmem_limit = _vmem_limit_bytes()

    # Contiguous reshape only (free view); no padding, no post-slice.
    x2 = x.reshape(BC, HW)
    wb = jnp.stack([weight, bias], axis=-1).astype(jnp.float32)  # (BC, 2)

    if tile_bc is None:
        isz = jnp.dtype(x.dtype).itemsize
        # Target ~2 MiB per x input buffer (HBM-roofline sweet spot).
        tile_bc = max(8, (2 * _MiB // max(1, HW * isz)) // 8 * 8)
        # Keep >= 4 grid steps when BC allows it (pipeline steady state).
        steps_cap = max(8, _round_up(pl.cdiv(BC, 4), 8))
        tile_bc = min(tile_bc, steps_cap)
        # VMEM footprint cap: 2x in + 2x out double-buffers + ~8 B/elem f32 temps.
        bytes_per_row = HW * (2 * isz + 2 * isz + 8)
        vmem_rows = max(8, (int(0.8 * vmem_limit) // bytes_per_row) // 8 * 8)
        tile_bc = min(tile_bc, vmem_rows)
    tile_bc = max(8, min(int(tile_bc), _round_up(BC, 8)))

    grid = (pl.cdiv(BC, tile_bc),)
    kernel = functools.partial(_adain_kernel, eps=float(eps), inv_hw=1.0 / float(HW))

    out = pl.pallas_call(
        kernel,
        out_shape=jax.ShapeDtypeStruct((BC, HW), x.dtype),
        grid=grid,
        in_specs=[
            pl.BlockSpec((tile_bc, HW), lambda i: (i, 0)),
            pl.BlockSpec((tile_bc, 2), lambda i: (i, 0)),
        ],
        out_specs=pl.BlockSpec((tile_bc, HW), lambda i: (i, 0)),
        compiler_params=pltpu.CompilerParams(
            dimension_semantics=("parallel",),
            vmem_limit_bytes=vmem_limit,
        ),
    )(x2, wb)

    return out.reshape(B, C, H, W)


def _reference(x, weight, bias, eps=1e-5):
    # Pure-JAX mirror of F.batch_norm(x.view(1, B*C, H, W), ..., training=True).
    B, C, H, W = x.shape
    xr = x.reshape(B * C, -1).astype(jnp.float32)
    mu = xr.mean(axis=-1, keepdims=True)
    var = ((xr - mu) ** 2).mean(axis=-1, keepdims=True)
    y = (xr - mu) / jnp.sqrt(var + eps)
    y = y * weight[:, None] + bias[:, None]
    return y.reshape(B, C, H, W).astype(x.dtype)


if __name__ == "__main__":
    eps = 1e-5
    root = jax.random.PRNGKey(0)

    def run_case(case_idx, B, C, H, W):
        kx, kw, kb = jax.random.split(jax.random.fold_in(root, case_idx), 3)
        x = jax.random.normal(kx, (B, C, H, W), dtype=jnp.float32)
        # In MUNIT weight/bias come from an MLP and are assigned before forward.
        weight = jax.random.normal(kw, (B * C,), dtype=jnp.float32)
        bias = jax.random.normal(kb, (B * C,), dtype=jnp.float32)
        out = adaptive_instance_norm_2d(x, weight, bias, eps=eps)
        out = jax.block_until_ready(out)
        ref = _reference(x, weight, bias, eps=eps)
        assert out.shape == (B, C, H, W)
        assert jnp.allclose(out, ref, atol=1e-4, rtol=1e-4), (
            f"mismatch vs reference for shape {(B, C, H, W)}")

    run_case(0, 2, 4, 16, 16)     # module-sized demo (B=2, C=4, 16x16)
    run_case(1, 2, 6, 17, 23)     # ragged H*W and B*C -> exercises masked lane tail / ragged last block
    run_case(2, 8, 128, 16, 16)   # multi-step grid (>= 4 steps)

    print("KERNEL_OK")
</pallas_src>

<mosaic_0001>
module attributes {stable_mosaic.version = 11 : i64} {
  func.func @_adain_kernel(%arg0: i32, %arg1: memref<8x256xf32, #tpu.memory_space<vmem>>, %arg2: memref<8x2xf32, #tpu.memory_space<vmem>>, %arg3: memref<8x256xf32, #tpu.memory_space<vmem>>) attributes {dimension_semantics = [#tpu.dimension_semantics<parallel>], iteration_bounds = array<i64: 1>, scalar_prefetch = 0 : i64, scratch_operands = 0 : i64, tpu.core_type = #tpu.core_type<tc>, window_params = [{transform_indices = @transform_0, window_bounds = array<i64: 8, 256>}, {transform_indices = @transform_1, window_bounds = array<i64: 8, 2>}, {transform_indices = @transform_2, window_bounds = array<i64: 8, 256>}]} {
    %c0 = arith.constant 0 : index
    %c0_0 = arith.constant 0 : index
    %0 = vector.load %arg1[%c0, %c0_0] : memref<8x256xf32, #tpu.memory_space<vmem>>, vector<8x256xf32>
    %cst = arith.constant dense<0.000000e+00> : vector<8xf32>
    %1 = vector.multi_reduction <add>, %0, %cst [1] : vector<8x256xf32> to vector<8xf32>
    %2 = vector.shape_cast %1 : vector<8xf32> to vector<8x1xf32>
    %cst_1 = arith.constant 3.906250e-03 : f32
    %3 = vector.broadcast %cst_1 : f32 to vector<8x1xf32>
    %4 = arith.mulf %2, %3 : vector<8x1xf32>
    %5 = vector.broadcast %4 : vector<8x1xf32> to vector<8x256xf32>
    %6 = arith.subf %0, %5 : vector<8x256xf32>
    %7 = arith.mulf %6, %6 : vector<8x256xf32>
    %cst_2 = arith.constant dense<0.000000e+00> : vector<8xf32>
    %8 = vector.multi_reduction <add>, %7, %cst_2 [1] : vector<8x256xf32> to vector<8xf32>
    %9 = vector.shape_cast %8 : vector<8xf32> to vector<8x1xf32>
    %cst_3 = arith.constant 3.906250e-03 : f32
    %10 = vector.broadcast %cst_3 : f32 to vector<8x1xf32>
    %11 = arith.mulf %9, %10 : vector<8x1xf32>
    %cst_4 = arith.constant 9.99999974E-6 : f32
    %12 = vector.broadcast %cst_4 : f32 to vector<8x1xf32>
    %13 = arith.addf %11, %12 : vector<8x1xf32>
    %14 = math.rsqrt %13 : vector<8x1xf32>
    %c0_5 = arith.constant 0 : index
    %c0_6 = arith.constant 0 : index
    %15 = vector.load %arg2[%c0_5, %c0_6] : memref<8x2xf32, #tpu.memory_space<vmem>>, vector<8x2xf32>
    %16 = vector.extract_strided_slice %15 {offsets = [0, 0], sizes = [8, 1], strides = [1, 1]} : vector<8x2xf32> to vector<8x1xf32>
    %17 = arith.mulf %14, %16 : vector<8x1xf32>
    %18 = vector.broadcast %17 : vector<8x1xf32> to vector<8x256xf32>
    %19 = arith.mulf %6, %18 : vector<8x256xf32>
    %20 = vector.extract_strided_slice %15 {offsets = [0, 1], sizes = [8, 1], strides = [1, 1]} : vector<8x2xf32> to vector<8x1xf32>
    %21 = vector.broadcast %20 : vector<8x1xf32> to vector<8x256xf32>
    %22 = arith.addf %19, %21 : vector<8x256xf32>
    %c0_7 = arith.constant 0 : index
    %c0_8 = arith.constant 0 : index
    %23 = vector.load %arg3[%c0_7, %c0_8] : memref<8x256xf32, #tpu.memory_space<vmem>>, vector<8x256xf32>
    tpu.vector_store %arg3[%c0_7, %c0_8], %22 {strides = array<i32>} : memref<8x256xf32, #tpu.memory_space<vmem>>, vector<8x256xf32>,
    return
  }
  func.func @transform_0(%arg0: i32) -> (i32, i32) {
    %c0_i32 = arith.constant 0 : i32
    %c0_i32_0 = arith.constant 0 : i32
    return %arg0, %c0_i32 : i32, i32
  }
  func.func @transform_1(%arg0: i32) -> (i32, i32) {
    %c0_i32 = arith.constant 0 : i32
    %c0_i32_0 = arith.constant 0 : i32
    return %arg0, %c0_i32 : i32, i32
  }
  func.func @transform_2(%arg0: i32) -> (i32, i32) {
    %c0_i32 = arith.constant 0 : i32
    %c0_i32_0 = arith.constant 0 : i32
    return %arg0, %c0_i32 : i32, i32
  }
}

</mosaic_0001>

<bundles_post_ra>
// kernel: tpu_custom_call.1
= control target key start
LH: loop header
LB: loop body
LE: loop exit
PB: predicated region body
PF: predicated region fallthrough
CT: control target
= control target key end

     0   :  { %7 = vsyncpa [#allocation3], 0  ;;  %s175_s0 = inlined_call_operand.hbm [shape: f32[8,256], index: 0, kind: input, shape index: {}]   ;;  %s176_s1 = inlined_call_operand.vmem [shape: f32[8,2], index: 1, kind: input, shape index: {}]   ;;  %s177_s2 = inlined_call_operand.hbm [shape: f32[8,256], index: 2, kind: output, shape index: {}]  }
   0x1   :  { %8 = vsyncpa [#allocation4], 0  ;;  %s14_s11 = sshll.u32 %s175_s0, 4  ;;  %s147_s12 = smov [#allocation2]   ;;  %s15_s11 = int_to_ptr.hbm [resolvable:$true] %s14_s11 }
   0x2   :  { %s16_s13 = sshll.u32 %s147_s12, 4  ;;  %s17_s13 = int_to_ptr.vmem [resolvable:$true] %s16_s13 }
   0x3   :  { %19 = dma.hbm_to_vmem [thread:$0]  %s15_s11, 256, %s17_s13, [#allocation3]  }
   0x4   :  { %143 = dma.done.wait [#allocation3], 256  }
   0x5   :  { %144 = vsyncadd [#allocation3], 4294967040  ;;  %v26_v0 = vld [vmem:[#allocation2] sm:$0xff]  ;;  %v27_v1 = vld [vmem:[#allocation2 + $0x8] sm:$0xff]  ;;  %v148_v10 = vmov 0   ;;  %v149_v11 = vmov 1  }
   0x6   :  { %v28_v2 = vadd.f32 %v27_v1, %v26_v0  ;;  %90 = vset.pattern.permute.xlu1 %v148_v10  ;;  %92 = vset.pattern.permute.xlu0 %v149_v11  ;;  %v51_v21 = vld [vmem:[%s176_s1] sm:$0xff]  ;;  %s150_s15 = smov [#allocation5]   ;;  %s76_s19 = sshll.u32 %s177_s2, 4  ;;  %s77_s19 = int_to_ptr.hbm [resolvable:$true] %s76_s19 }
   0x7   :  { %s74_s16 = sshll.u32 %s150_s15, 4  ;;  %s75_s16 = int_to_ptr.vmem [resolvable:$true] %s74_s16 }
   0x8   :  { %29 = vadd.xlane.f32.xlu0 %v28_v2 }
  0x7b   :  { %v30_v3 = vpop.xlane.xlu0 %29 }
  0x7c   :  { %v31_v4 = vmul.f32 0.00390625, %v30_v3 }
  0x7e   :  { %v32_v5 = vsub.f32 %v26_v0, %v31_v4  ;;  %v33_v6 = vsub.f32 %v27_v1, %v31_v4 }
  0x80   :  { %v34_v7 = vmul.f32 %v32_v5, %v32_v5  ;;  %v35_v8 = vmul.f32 %v33_v6, %v33_v6 }
  0x82   :  { %v36_v9 = vadd.f32 %v35_v8, %v34_v7 }
  0x84   :  { %37 = vadd.xlane.f32.xlu0 %v36_v9 }
  0xf7   :  { %v38_v12 = vpop.xlane.xlu0 %37 }
  0xf8   :  { %v39_v13 = vmul.f32 0.00390625, %v38_v12 }
  0xfa   :  { %v40_v14 = vadd.f32 1e-05, %v39_v13 }
  0xfc   :  { %93 = vrsqrt.f32 %v40_v14  ;;  %vm47_vm1 = vweird.f32 %v40_v14 }
 0x102   :  { %v94_v15 = vpop.eup %93 }
 0x103   :  { %v42_v16 = vmul.f32 %v94_v15, %v40_v14  ;;  %vm48_vm0 = vweird.f32 %v94_v15 }
 0x104   :  { %vm49_vm2 = vmor %vm47_vm1, %vm48_vm0 }
 0x105   :  { %v43_v17 = vmul.f32 %v94_v15, %v42_v16 }
 0x107   :  { %v44_v18 = vmul.f32 0.5, %v43_v17 }
 0x109   :  { %v45_v19 = vsub.f32 1.5, %v44_v18 }
 0x10b   :  { %v46_v20 = vmul.f32 %v94_v15, %v45_v19 }
 0x10d   :  { %v50_v22 = vsel %vm49_vm2, %v94_v15, %v46_v20 }
 0x10e   :  { %v52_v23 = vmul.f32 %v51_v21, %v50_v22 }
 0x110   :  { %55 = vperm.xlu1 %90, %v52_v23  }
 0x118   :  { %91 = vset.pattern.permute.xlu1 %v149_v11 }
 0x119   :  { %62 = vperm.xlu1 %91, %v51_v21  }
 0x182   :  { %v56_v24 = vpop.permute.xlu1 %55 }
 0x183   :  { %v58_v25 = vmul.f32 %v56_v24, %v32_v5  ;;  %v59_v26 = vmul.f32 %v56_v24, %v33_v6 }
 0x18b   :  { %v63_v27 = vpop.permute.xlu1 %62 }
 0x18c   :  { %v65_v28 = vadd.f32 %v63_v27, %v58_v25  ;;  %v66_v29 = vadd.f32 %v63_v27, %v59_v26 }
 0x18e   :  { %67 = vst [vmem:[#allocation5] sm:$0xff] %v65_v28 }
 0x18f   :  { %68 = vst [vmem:[#allocation5 + $0x8] sm:$0xff] %v66_v29 }
 0x190   :  { %79 = dma.vmem_to_hbm [thread:$0]  %s75_s16, 256, %s77_s19, [#allocation4]  }
 0x191   :  { %145 = dma.done.wait [#allocation4], 256  }
 0x192   :  { %146 = vsyncadd [#allocation4], 4294967040 }
 0x193   :  { %84 = vsyncpa [#allocation3], 1 }
 0x194   :  { %85 = vsyncpa [#allocation4], 1 }

</bundles_post_ra>
